<compile_context>
chip_gen: v7x
topology: tpu7x:2x2x1
jax: 0.10.0
libtpu: 0.0.40
codegen_flags: <defaults>
</compile_context>

<pallas_src>
import functools

import jax
import jax.numpy as jnp
from jax.experimental import pallas as pl
from jax.experimental.pallas import tpu as pltpu

_LANES = 128


def _round_up(x, m):
    return ((x + m - 1) // m) * m


def _cdiv(a, b):
    return (a + b - 1) // b


def _conv1x1_kernel(w_ref, b_ref, x_ref, o_ref, *, c_in, c_out):
    """Per-tile 1x1x1 conv as dense VPU broadcast-FMAs.

    w_ref: (C_out, C_in) f32 in SMEM (scalar weights)
    b_ref: (C_out,)      f32 in SMEM (scalar bias)
    x_ref: (C_in,  ROWS_TILE, 128) in VMEM
    o_ref: (C_out, ROWS_TILE, 128) in VMEM
    """
    # Load each input channel once as a full-density (ROWS_TILE, 128) tile
    # and reuse it for every output channel.
    xs = [x_ref[ci].astype(jnp.float32) for ci in range(c_in)]

    for co in range(c_out):
        acc = xs[0] * w_ref[co, 0]
        for ci in range(1, c_in):
            acc = acc + xs[ci] * w_ref[co, ci]
        # Direct per-channel, lane-dense store (no concatenate / relayout).
        o_ref[co] = (acc + b_ref[co]).astype(o_ref.dtype)


def outconv_pallas(x, weight, bias, *, rows_per_tile=1024):
    """1x1x1 Conv3d forward (PyTorch `outconv`).

    Args:
      x:      (N, C_in, D, H, W)  -- NCDHW, same as PyTorch.
      weight: (C_out, C_in)       -- squeezed Conv3d weight (C_out, C_in, 1, 1, 1).
      bias:   (C_out,)
      rows_per_tile: target sublane rows (x128 lanes) per grid step.
                     Default 1024 rows = 128K voxels per step (~7 MiB of
                     double-buffered VMEM at C_in=4/C_out=3: fits default
                     scoped VMEM on v5e/v6e/v7x).
    Returns:
      (N, C_out, D, H, W)
    """
    N, C_in, D, H, W = x.shape
    C_out = weight.shape[0]
    L = D * H * W

    # Free, contiguous reshape: flatten the spatial volume.
    x3 = x.reshape(N, C_in, L)

    # Lane axis must be exactly 128 wide; pad only if L % 128 != 0 (typical
    # UNet volumes are powers of two, so this pad is normally a no-op).
    # TODO(synk): fold the <128-lane remainder into the kernel with a masked
    # last-lane store instead of this (tiny) pad+slice when L % 128 != 0.
    l_pad = _round_up(L, _LANES)
    if l_pad != L:
        x3 = jnp.pad(x3, ((0, 0), (0, 0), (0, l_pad - L)))
    R = l_pad // _LANES

    # Dense (rows, lanes) layout: every channel slice is a full-density 2-D
    # tile, so each vreg carries 8x128 useful elements.
    x4 = x3.reshape(N, C_in, R, _LANES)

    # Balanced row tiling: rows_tile is a multiple of 8 (or the full R when
    # R < target), and the ragged last tile (if any) is masked by Pallas.
    target_rows = max(8, _round_up(rows_per_tile, 8))
    if R <= target_rows:
        rows_tile = R
        num_row_tiles = 1
    else:
        num_row_tiles = _cdiv(R, target_rows)
        rows_tile = _round_up(_cdiv(R, num_row_tiles), 8)
        num_row_tiles = _cdiv(R, rows_tile)

    # Tiny weights/bias live entirely in SMEM (scalar reads, no VMEM streams).
    w_s = weight.astype(jnp.float32)   # (C_out, C_in)
    b_s = bias.astype(jnp.float32)     # (C_out,)

    kernel = functools.partial(_conv1x1_kernel, c_in=C_in, c_out=C_out)

    out4 = pl.pallas_call(
        kernel,
        out_shape=jax.ShapeDtypeStruct((N, C_out, R, _LANES), x.dtype),
        grid_spec=pltpu.PrefetchScalarGridSpec(
            num_scalar_prefetch=0,
            grid=(N, num_row_tiles),
            in_specs=[
                pl.BlockSpec(memory_space=pltpu.MemorySpace.SMEM),   # weights
                pl.BlockSpec(memory_space=pltpu.MemorySpace.SMEM),   # bias
                pl.BlockSpec((None, C_in, rows_tile, _LANES),
                             lambda n, r: (n, 0, r, 0)),
            ],
            out_specs=pl.BlockSpec((None, C_out, rows_tile, _LANES),
                                   lambda n, r: (n, 0, r, 0)),
        ),
        compiler_params=pltpu.CompilerParams(
            dimension_semantics=("parallel", "parallel")),
    )(w_s, b_s, x4)

    out3 = out4.reshape(N, C_out, l_pad)
    if l_pad != L:
        out3 = out3[:, :, :L]
    return out3.reshape(N, C_out, D, H, W)


if __name__ == "__main__":
    # Small shapes consistent with the module: batch=2, in_ch=4, out_ch=3,
    # spatial 8x8x8 volume.
    N, C_in, C_out, D, H, W = 2, 4, 3, 8, 8, 8

    key = jax.random.PRNGKey(0)
    kx, kw, kb = jax.random.split(key, 3)

    x = jax.random.normal(kx, (N, C_in, D, H, W), dtype=jnp.float32)
    # Conv3d weight is (C_out, C_in, 1, 1, 1); we keep the squeezed (C_out, C_in).
    weight = jax.random.normal(kw, (C_out, C_in), dtype=jnp.float32) * 0.1
    bias = jax.random.normal(kb, (C_out,), dtype=jnp.float32) * 0.1

    out = outconv_pallas(x, weight, bias)
    out = jax.block_until_ready(out)

    # Reference check in plain JAX (same math as nn.Conv3d with kernel 1).
    ref = jnp.einsum("ncdhw,oc->nodhw", x, weight) + bias[None, :, None, None, None]
    assert out.shape == (N, C_out, D, H, W)
    assert jnp.allclose(out, ref, atol=1e-5, rtol=1e-5)

    print("KERNEL_OK")
</pallas_src>

<mosaic_0001>
module attributes {stable_mosaic.version = 11 : i64} {
  func.func @_conv1x1_kernel(%arg0: i32, %arg1: i32, %arg2: memref<3x4xf32, #tpu.memory_space<smem>>, %arg3: memref<3xf32, #tpu.memory_space<smem>>, %arg4: memref<1x4x4x128xf32, #tpu.memory_space<vmem>>, %arg5: memref<1x3x4x128xf32, #tpu.memory_space<vmem>>) attributes {dimension_semantics = [#tpu.dimension_semantics<parallel>, #tpu.dimension_semantics<parallel>], iteration_bounds = array<i64: 2, 1>, scalar_prefetch = 0 : i64, scratch_operands = 0 : i64, tpu.core_type = #tpu.core_type<tc>, window_params = [{transform_indices = @transform_0, window_bounds = array<i64: 3, 4>}, {transform_indices = @transform_1, window_bounds = array<i64: 3>}, {transform_indices = @transform_2, window_bounds = array<i64: 1, 4, 4, 128>}, {transform_indices = @transform_3, window_bounds = array<i64: 1, 3, 4, 128>}]} {
    %c0 = arith.constant 0 : index
    %c0_0 = arith.constant 0 : index
    %c0_1 = arith.constant 0 : index
    %c0_2 = arith.constant 0 : index
    %0 = vector.load %arg4[%c0, %c0_0, %c0_1, %c0_2] : memref<1x4x4x128xf32, #tpu.memory_space<vmem>>, vector<1x1x4x128xf32>
    %1 = vector.shape_cast %0 : vector<1x1x4x128xf32> to vector<4x128xf32>
    %c0_3 = arith.constant 0 : index
    %c1 = arith.constant 1 : index
    %c0_4 = arith.constant 0 : index
    %c0_5 = arith.constant 0 : index
    %2 = vector.load %arg4[%c0_3, %c1, %c0_4, %c0_5] : memref<1x4x4x128xf32, #tpu.memory_space<vmem>>, vector<1x1x4x128xf32>
    %3 = vector.shape_cast %2 : vector<1x1x4x128xf32> to vector<4x128xf32>
    %c0_6 = arith.constant 0 : index
    %c2 = arith.constant 2 : index
    %c0_7 = arith.constant 0 : index
    %c0_8 = arith.constant 0 : index
    %4 = vector.load %arg4[%c0_6, %c2, %c0_7, %c0_8] : memref<1x4x4x128xf32, #tpu.memory_space<vmem>>, vector<1x1x4x128xf32>
    %5 = vector.shape_cast %4 : vector<1x1x4x128xf32> to vector<4x128xf32>
    %c0_9 = arith.constant 0 : index
    %c3 = arith.constant 3 : index
    %c0_10 = arith.constant 0 : index
    %c0_11 = arith.constant 0 : index
    %6 = vector.load %arg4[%c0_9, %c3, %c0_10, %c0_11] : memref<1x4x4x128xf32, #tpu.memory_space<vmem>>, vector<1x1x4x128xf32>
    %7 = vector.shape_cast %6 : vector<1x1x4x128xf32> to vector<4x128xf32>
    %c0_12 = arith.constant 0 : index
    %c0_13 = arith.constant 0 : index
    %8 = memref.load %arg2[%c0_12, %c0_13] : memref<3x4xf32, #tpu.memory_space<smem>>
    %9 = vector.broadcast %8 : f32 to vector<4x128xf32>
    %10 = arith.mulf %1, %9 : vector<4x128xf32>
    %c0_14 = arith.constant 0 : index
    %c1_15 = arith.constant 1 : index
    %11 = memref.load %arg2[%c0_14, %c1_15] : memref<3x4xf32, #tpu.memory_space<smem>>
    %12 = vector.broadcast %11 : f32 to vector<4x128xf32>
    %13 = arith.mulf %3, %12 : vector<4x128xf32>
    %14 = arith.addf %10, %13 : vector<4x128xf32>
    %c0_16 = arith.constant 0 : index
    %c2_17 = arith.constant 2 : index
    %15 = memref.load %arg2[%c0_16, %c2_17] : memref<3x4xf32, #tpu.memory_space<smem>>
    %16 = vector.broadcast %15 : f32 to vector<4x128xf32>
    %17 = arith.mulf %5, %16 : vector<4x128xf32>
    %18 = arith.addf %14, %17 : vector<4x128xf32>
    %c0_18 = arith.constant 0 : index
    %c3_19 = arith.constant 3 : index
    %19 = memref.load %arg2[%c0_18, %c3_19] : memref<3x4xf32, #tpu.memory_space<smem>>
    %20 = vector.broadcast %19 : f32 to vector<4x128xf32>
    %21 = arith.mulf %7, %20 : vector<4x128xf32>
    %22 = arith.addf %18, %21 : vector<4x128xf32>
    %c0_20 = arith.constant 0 : index
    %23 = memref.load %arg3[%c0_20] : memref<3xf32, #tpu.memory_space<smem>>
    %24 = vector.broadcast %23 : f32 to vector<4x128xf32>
    %25 = arith.addf %22, %24 : vector<4x128xf32>
    %c0_21 = arith.constant 0 : index
    %c0_22 = arith.constant 0 : index
    %c0_23 = arith.constant 0 : index
    %c0_24 = arith.constant 0 : index
    %26 = vector.load %arg5[%c0_21, %c0_22, %c0_23, %c0_24] : memref<1x3x4x128xf32, #tpu.memory_space<vmem>>, vector<1x1x4x128xf32>
    %27 = vector.shape_cast %26 : vector<1x1x4x128xf32> to vector<4x128xf32>
    %28 = vector.shape_cast %25 : vector<4x128xf32> to vector<1x1x4x128xf32>
    tpu.vector_store %arg5[%c0_21, %c0_22, %c0_23, %c0_24], %28 {strides = array<i32>} : memref<1x3x4x128xf32, #tpu.memory_space<vmem>>, vector<1x1x4x128xf32>,
    %c1_25 = arith.constant 1 : index
    %c0_26 = arith.constant 0 : index
    %29 = memref.load %arg2[%c1_25, %c0_26] : memref<3x4xf32, #tpu.memory_space<smem>>
    %30 = vector.broadcast %29 : f32 to vector<4x128xf32>
    %31 = arith.mulf %1, %30 : vector<4x128xf32>
    %c1_27 = arith.constant 1 : index
    %c1_28 = arith.constant 1 : index
    %32 = memref.load %arg2[%c1_27, %c1_28] : memref<3x4xf32, #tpu.memory_space<smem>>
    %33 = vector.broadcast %32 : f32 to vector<4x128xf32>
    %34 = arith.mulf %3, %33 : vector<4x128xf32>
    %35 = arith.addf %31, %34 : vector<4x128xf32>
    %c1_29 = arith.constant 1 : index
    %c2_30 = arith.constant 2 : index
    %36 = memref.load %arg2[%c1_29, %c2_30] : memref<3x4xf32, #tpu.memory_space<smem>>
    %37 = vector.broadcast %36 : f32 to vector<4x128xf32>
    %38 = arith.mulf %5, %37 : vector<4x128xf32>
    %39 = arith.addf %35, %38 : vector<4x128xf32>
    %c1_31 = arith.constant 1 : index
    %c3_32 = arith.constant 3 : index
    %40 = memref.load %arg2[%c1_31, %c3_32] : memref<3x4xf32, #tpu.memory_space<smem>>
    %41 = vector.broadcast %40 : f32 to vector<4x128xf32>
    %42 = arith.mulf %7, %41 : vector<4x128xf32>
    %43 = arith.addf %39, %42 : vector<4x128xf32>
    %c1_33 = arith.constant 1 : index
    %44 = memref.load %arg3[%c1_33] : memref<3xf32, #tpu.memory_space<smem>>
    %45 = vector.broadcast %44 : f32 to vector<4x128xf32>
    %46 = arith.addf %43, %45 : vector<4x128xf32>
    %c0_34 = arith.constant 0 : index
    %c1_35 = arith.constant 1 : index
    %c0_36 = arith.constant 0 : index
    %c0_37 = arith.constant 0 : index
    %47 = vector.load %arg5[%c0_34, %c1_35, %c0_36, %c0_37] : memref<1x3x4x128xf32, #tpu.memory_space<vmem>>, vector<1x1x4x128xf32>
    %48 = vector.shape_cast %47 : vector<1x1x4x128xf32> to vector<4x128xf32>
    %49 = vector.shape_cast %46 : vector<4x128xf32> to vector<1x1x4x128xf32>
    tpu.vector_store %arg5[%c0_34, %c1_35, %c0_36, %c0_37], %49 {strides = array<i32>} : memref<1x3x4x128xf32, #tpu.memory_space<vmem>>, vector<1x1x4x128xf32>,
    %c2_38 = arith.constant 2 : index
    %c0_39 = arith.constant 0 : index
    %50 = memref.load %arg2[%c2_38, %c0_39] : memref<3x4xf32, #tpu.memory_space<smem>>
    %51 = vector.broadcast %50 : f32 to vector<4x128xf32>
    %52 = arith.mulf %1, %51 : vector<4x128xf32>
    %c2_40 = arith.constant 2 : index
    %c1_41 = arith.constant 1 : index
    %53 = memref.load %arg2[%c2_40, %c1_41] : memref<3x4xf32, #tpu.memory_space<smem>>
    %54 = vector.broadcast %53 : f32 to vector<4x128xf32>
    %55 = arith.mulf %3, %54 : vector<4x128xf32>
    %56 = arith.addf %52, %55 : vector<4x128xf32>
    %c2_42 = arith.constant 2 : index
    %c2_43 = arith.constant 2 : index
    %57 = memref.load %arg2[%c2_42, %c2_43] : memref<3x4xf32, #tpu.memory_space<smem>>
    %58 = vector.broadcast %57 : f32 to vector<4x128xf32>
    %59 = arith.mulf %5, %58 : vector<4x128xf32>
    %60 = arith.addf %56, %59 : vector<4x128xf32>
    %c2_44 = arith.constant 2 : index
    %c3_45 = arith.constant 3 : index
    %61 = memref.load %arg2[%c2_44, %c3_45] : memref<3x4xf32, #tpu.memory_space<smem>>
    %62 = vector.broadcast %61 : f32 to vector<4x128xf32>
    %63 = arith.mulf %7, %62 : vector<4x128xf32>
    %64 = arith.addf %60, %63 : vector<4x128xf32>
    %c2_46 = arith.constant 2 : index
    %65 = memref.load %arg3[%c2_46] : memref<3xf32, #tpu.memory_space<smem>>
    %66 = vector.broadcast %65 : f32 to vector<4x128xf32>
    %67 = arith.addf %64, %66 : vector<4x128xf32>
    %c0_47 = arith.constant 0 : index
    %c2_48 = arith.constant 2 : index
    %c0_49 = arith.constant 0 : index
    %c0_50 = arith.constant 0 : index
    %68 = vector.load %arg5[%c0_47, %c2_48, %c0_49, %c0_50] : memref<1x3x4x128xf32, #tpu.memory_space<vmem>>, vector<1x1x4x128xf32>
    %69 = vector.shape_cast %68 : vector<1x1x4x128xf32> to vector<4x128xf32>
    %70 = vector.shape_cast %67 : vector<4x128xf32> to vector<1x1x4x128xf32>
    tpu.vector_store %arg5[%c0_47, %c2_48, %c0_49, %c0_50], %70 {strides = array<i32>} : memref<1x3x4x128xf32, #tpu.memory_space<vmem>>, vector<1x1x4x128xf32>,
    return
  }
  func.func @transform_0(%arg0: i32, %arg1: i32) -> (i32, i32) {
    %c0_i32 = arith.constant 0 : i32
    %c0_i32_0 = arith.constant 0 : i32
    %c0_i32_1 = arith.constant 0 : i32
    return %c0_i32, %c0_i32_0 : i32, i32
  }
  func.func @transform_1(%arg0: i32, %arg1: i32) -> i32 {
    %c0_i32 = arith.constant 0 : i32
    %c0_i32_0 = arith.constant 0 : i32
    return %c0_i32 : i32
  }
  func.func @transform_2(%arg0: i32, %arg1: i32) -> (i32, i32, i32, i32) {
    %c0_i32 = arith.constant 0 : i32
    %c0_i32_0 = arith.constant 0 : i32
    %c0_i32_1 = arith.constant 0 : i32
    return %arg0, %c0_i32, %arg1, %c0_i32_0 : i32, i32, i32, i32
  }
  func.func @transform_3(%arg0: i32, %arg1: i32) -> (i32, i32, i32, i32) {
    %c0_i32 = arith.constant 0 : i32
    %c0_i32_0 = arith.constant 0 : i32
    %c0_i32_1 = arith.constant 0 : i32
    return %arg0, %c0_i32, %arg1, %c0_i32_0 : i32, i32, i32, i32
  }
}

</mosaic_0001>

<bundles_post_ra>
// kernel: tpu_custom_call.1
= control target key start
LH: loop header
LB: loop body
LE: loop exit
PB: predicated region body
PF: predicated region fallthrough
CT: control target
= control target key end

     0   :  { %8 = vsyncpa [#allocation5], 0  ;;  %s958_s0 = inlined_call_operand.hbm [shape: f32[3,4], index: 0, kind: input, shape index: {}]   ;;  %s959_s1 = inlined_call_operand.vmem [shape: f32[3], index: 1, kind: input, shape index: {}]   ;;  %s960_s2 = inlined_call_operand.hbm [shape: f32[2,4,4,128], index: 2, kind: input, shape index: {}]   ;;  %s961_s3 = inlined_call_operand.hbm [shape: f32[2,3,4,128], index: 3, kind: output, shape index: {}]  }
   0x1   :  { %9 = vsyncpa [#allocation6], 0 }
   0x2   :  { %10 = vsyncpa [#allocation3], 0 }
   0x3   :  { %12 = vsyncpa [#allocation3 + $0x1], 0 }
   0x4   :  { %13 = vsyncpa [#allocation4], 0 }
   0x5   :  { %15 = vsyncpa [#allocation4 + $0x1], 0  ;;  %s723_s12 = smov 0   ;;  %s725_s13 = smov 0  }
   0x6   :  { %s727_s14 = smov 0   ;;  %s729_s15 = smov 0  }
   0x7   :  { %s731_s16 = smov 0   ;;  %s733_s17 = smov 0  }
   0x8 LB: > { %s421_s18 = sadd.s32 4294967295, %s693_s17   ;;  %s422_s19 = sadd.s32 4294967294, %s693_s17   ;;  %s693_s17 = sphi %s733_s17, %s21_s17   ;;  %s689_s16 = sphi %s731_s16, %s982_s16   ;;  %s685_s15 = sphi %s729_s15, %s981_s15   ;;  %s681_s14 = sphi %s727_s14, %s980_s14   ;;  %s677_s13 = sphi %s725_s13, %s979_s13   ;;  %s673_s12 = sphi %s723_s12, %s978_s12  }
   0x9   : > { %s84_s20 = sadd.s32 1, %s681_s14  ;;  %p91_p0 = scmp.ne.s32.totalorder %s681_s14, %s677_s13 }
   0xa   : > { %p92_p1 = scmp.eq.s32.totalorder %s693_s17, 0  ;;  %p97_p2 = scmp.ne.s32.totalorder %s677_s13, %s673_s12 }
   0xb   : > { %p761_p3 = scmp.eq.s32.totalorder %s421_s18, 0  ;;  %p123_p4 = scmp.eq.s32.totalorder %s421_s18, 1 }
   0xc   : > { %p93_p5 = por %p92_p1, %p91_p0  ;;  %p129_p6 = scmp.eq.s32.totalorder %s422_s19, 1 }
   0xd   : > { %s966_s21 = scalar_select %p761_p3, 1, 0 }
   0xe   : > { %p767_p7 = por %p761_p3, %p97_p2  ;;  %p771_p8 = por %p123_p4, %p91_p0 }
   0xf   : > { %p775_p9 = por %p129_p6, %p97_p2  ;;  %p423_p10 = scmp.ge.s32.totalorder %s693_s17, 1 }
  0x10   : > { %s967_s22 = scalar_select %p767_p7, 1, 0 }
  0x11   : > { %s968_s23 = scalar_select %p771_p8, 1, 0 }
  0x12   : > { %s969_s24 = scalar_select %p775_p9, 1, 0 }
  0x13   : > { %p136_p11 = scmp.lt.s32.totalorder %s693_s17, 3  ;;  %p487_p1 = scmp.lt.s32.totalorder %s693_s17, 2 }
  0x14   : > { %s158_s28 = sshll.u32 %s959_s1, 4  ;;  %s169_s4 = sand.u32 1, %s681_s14   ;;  %s159_s28 = int_to_ptr.vmem [resolvable:$true] %s158_s28 }
  0x15   : > { %p782_p13 = pnand %p423_p10, %p136_p11  ;;  %p792_p4 = pnand %p487_p1, %p93_p5 }
  0x16   : > { %s33_s5 = sadd.s32 1, %s689_s16  ;;  %s545_s8 = scalar_lea.hbm %s958_s0, 64 }
  0x17   : > { %p470_p0 = pneg %p782_p13  ;;  %p546_p5 = scmp.ne.s32.totalorder %s958_s0, %s545_s8 }
  0x18   : > { %p552_p1 = scmp.lt.u32.totalorder %s545_s8, %s958_s0 }
  0x19   : > { %p798_p2 = pnand %p470_p0, %p761_p3 }
  0x1b   : > { %p547_p6 = pneg %p798_p2 }
  0x1d   : > { %p548_p10 = pnand %p547_p6, %p546_p5 }
  0x1f   : > { %p549_p11 = pneg %p548_p10 }
  0x21   : > { %p554_p0 = pnand %p552_p1, %p549_p11 }
  0x23   : > { %557 = shalt.err (!%p554_p0)
}
  0x24   : > { %s695_s19 = smov [#allocation2]   ;;  %s558_s6 = scalar_lea.vmem %s159_s28, 16 }
  0x25   : > { %473 = dma.hbm_to_smem (!%p798_p2), %s958_s0, 64, %s695_s19, [#allocation5]  }
  0x26   : > { %p559_p12 = scmp.ne.s32.totalorder %s159_s28, %s558_s6  ;;  %p566_p7 = scmp.lt.s32.totalorder %s159_s28, %s159_s28 }
  0x27   : > { %p567_p5 = scmp.lt.s32.totalorder %s558_s6, %s558_s6 }
  0x28   : > { %p561_p9 = pnand %p559_p12, %p547_p6 }
  0x29   : > { %p568_p10 = por %p567_p5, %p566_p7 }
  0x2a   : > { %p562_p8 = pneg %p561_p9 }
  0x2c   : > { %p569_p3 = pnand %p568_p10, %p562_p8 }
  0x2e   : > { %572 = shalt.err (!%p569_p3)
}
  0x2f   : > { %s696_s7 = smov [#allocation7]   ;;  %p35_p11 = scmp.ge.s32.totalorder %s33_s5, 2 }
  0x30   : > { %476 = dma.vmem_to_smem (!%p798_p2), %s159_s28, 16, %s696_s7, [#allocation6]  }
  0x31   : > { %s427_s8 = sshll.u32 %s169_s4, 4  ;;  %s455_s9 = sshll.u32 %s689_s16, 8 }
  0x32   : > { %s984_s5 = smov (%p35_p11, %s33_s5), 0  ;;  %s830_s30 = scalar_lea.hbm %s960_s2, %s455_s9 }
  0x33   : > { %s79_s18 = ssub.s32 %s689_s16, %s984_s5  ;;  %s173_s19 = scalar_lea.vmem [#allocation8], %s427_s8 }
  0x34   : > { %s181_s28 = sshll.u32 %s173_s19, 4  ;;  %p82_p3 = scmp.eq.s32.totalorder %s79_s18, 0  ;;  %s834_s28 = int_to_ptr.vmem [resolvable:$true] %s181_s28 }
  0x35   : > { %s843_s27 = scalar_lea.sflag [#allocation3], %s169_s4  ;;  %s573_s6 = scalar_lea.hbm %s830_s30, 256 }
  0x36   : > { %s839_s26 = scalar_select %p82_p3, %s681_s14, %s84_s20  }
  0x37   : > { %p574_p7 = scmp.ne.s32.totalorder %s830_s30, %s573_s6  ;;  %p575_p8 = pneg %p792_p4 }
  0x38   : > { %s578_s9 = scalar_lea.hbm %s960_s2, 512  ;;  %p579_p2 = scmp.lt.u32.totalorder %s830_s30, %s960_s2 }
  0x39   : > { %p576_p9 = pnand %p575_p8, %p574_p7  ;;  %p580_p6 = scmp.lt.u32.totalorder %s578_s9, %s573_s6 }
  0x3a   : > { %p582_p0 = scmp.lt.u32.totalorder %s573_s6, %s830_s30 }
  0x3b   : > { %p577_p12 = pneg %p576_p9  ;;  %p581_p1 = por %p580_p6, %p579_p2 }
  0x3d   : > { %p583_p5 = por %p582_p0, %p581_p1 }
  0x3f   : > { %p584_p10 = pnand %p583_p5, %p577_p12 }
  0x41   : > { %587 = shalt.err (!%p584_p10)
}
  0x42   : > { %s588_s20 = scalar_lea.vmem %s834_s28, 256  ;;  %s697_s4 = smov [#allocation8]  }
  0x43   : > { %p589_p11 = scmp.ne.s32.totalorder %s834_s28, %s588_s20  ;;  %s593_s18 = sshll.u32 %s697_s4, 4  ;;  %s594_s18 = int_to_ptr.vmem [resolvable:$false] %s593_s18 }
  0x44   : > { %s595_s19 = scalar_lea.vmem %s594_s18, 512  ;;  %p596_p9 = scmp.lt.s32.totalorder %s834_s28, %s594_s18 }
  0x45   : > { %p591_p3 = pnand %p589_p11, %p575_p8  ;;  %p597_p2 = scmp.lt.s32.totalorder %s595_s19, %s588_s20 }
  0x47   : > { %p592_p7 = pneg %p591_p3  ;;  %p598_p6 = por %p597_p2, %p596_p9 }
  0x49   : > { %p599_p1 = pnand %p598_p6, %p592_p7 }
  0x4b   : > { %602 = shalt.err (!%p599_p1)
}
  0x4c   : > { %s698_s6 = smov 64   ;;  %s699_s7 = smov 4  }
  0x4d   : > { %480 = dma.hbm_to_vmem [thread:$0]  (!%p792_p4), %s830_s30, 256, %s834_s28, %s843_s27, %s698_s6, %s698_s6, %s699_s7  }
  0x4e   : > { %193 = sbr.rel (%p782_p13) target bundleno = 131 (0x83), region = 32  ;;  %p973_p8 = scmp.ne.s32.totalorder (!%p782_p13), %s966_s21, 0 }
  0x55   : > { %656 = dma.done.wait (%p973_p8), [#allocation5], 64  }
  0x56   : > { %658 = vsyncadd (%p973_p8), [#allocation5], 4294967232 }
  0x57   : > { %660 = dma.done.wait (%p973_p8), [#allocation6], 16  }
  0x58   : > { %662 = vsyncadd (%p973_p8), [#allocation6], 4294967280  ;;  %s882_s8 = sand.u32 1, %s677_s13   ;;  %p974_p13 = scmp.ne.s32.totalorder %s967_s22, 0 }
  0x59   : > { %s433_s25 = sshll.u32 %s882_s8, 4  ;;  %s204_s29 = scalar_lea.sflag [#allocation3], %s882_s8 }
  0x5a   : > { %s207_s30 = scalar_lea.vmem [#allocation8], %s433_s25 }
  0x5b   : > { %664 = dma.done.wait (%p974_p13), %s204_s29, 256  }
  0x5c   : > { %666 = vsyncadd (%p974_p13), %s204_s29, 4294967040 }
  0x5d   : > { %212 = sfence }
  0x5e   : > { %s238_s28 = sld [smem:[#allocation2]]  ;;  %s437_s27 = sld [smem:[#allocation2 + $0x1]]  ;;  %v231_v0 = vld [vmem:[%s207_s30] sm:$0xf]  ;;  %v434_v1 = vld [vmem:[%s207_s30 + $0x4] sm:$0xf] }
  0x5f   : > { %s438_s9 = sld [smem:[#allocation2 + $0x2]]  ;;  %s439_s21 = sld [smem:[#allocation2 + $0x3]]  ;;  %v435_v2 = vld [vmem:[%s207_s30 + $0x8] sm:$0xf]  ;;  %v436_v4 = vld [vmem:[%s207_s30 + $0xc] sm:$0xf] }
  0x60   : > { %s890_s10 = sld [smem:[#allocation7]]  ;;  %s441_s20 = sld [smem:[#allocation2 + $0x81]] }
  0x61   : > { %s440_s11 = sld [smem:[#allocation2 + $0x80]]  ;;  %s442_s4 = sld [smem:[#allocation2 + $0x82]] }
  0x62   : > { %s443_s18 = sld [smem:[#allocation2 + $0x83]]  ;;  %s446_s22 = sld [smem:[#allocation2 + $0x100]] }
  0x63   : > { %s447_s19 = sld [smem:[#allocation2 + $0x101]]  ;;  %s448_s6 = sld [smem:[#allocation2 + $0x102]] }
  0x64   : > { %v239_v3 = vstv %s238_s28  ;;  %v242_v6 = vstv %s437_s27  ;;  %s892_s7 = sld [smem:[#allocation2 + $0x103]]  ;;  %s894_s25 = sld [smem:[#allocation7 + $0x1]] }
  0x65   : > { %v240_v5 = vmul.f32 %v239_v3, %v231_v0  ;;  %v243_v7 = vmul.f32 %v434_v1, %v242_v6  ;;  %v246_v8 = vstv %s438_s9  ;;  %v250_v9 = vstv %s439_s21  ;;  %s456_s29 = smul.u32 12, %s882_s8  ;;  %s897_s30 = sld [smem:[#allocation7 + $0x2]] }
  0x66   : > { %v247_v10 = vmul.f32 %v435_v2, %v246_v8  ;;  %v251_v12 = vmul.f32 %v436_v4, %v250_v9  ;;  %v261_v15 = vstv %s441_s20  ;;  %v254_v21 = vstv %s890_s10  ;;  %s457_s9 = smul.u32 192, %s685_s15  ;;  %s298_s20 = scalar_lea.sflag [#allocation4], %s882_s8 }
  0x67   : > { %v244_v11 = vadd.f32 %v243_v7, %v240_v5  ;;  %v258_v13 = vstv %s440_s11  ;;  %v265_v16 = vstv %s442_s4  ;;  %v262_v18 = vmul.f32 %v434_v1, %v261_v15  ;;  %s230_s28 = scalar_lea.vmem [#allocation9], %s456_s29  ;;  %p975_p12 = scmp.ne.s32.totalorder %s968_s23, 0 }
  0x68   : > { %v259_v14 = vmul.f32 %v258_v13, %v231_v0  ;;  %v266_v19 = vmul.f32 %v435_v2, %v265_v16  ;;  %v269_v20 = vstv %s443_s18  ;;  %v278_v23 = vstv %s446_s22  ;;  %s312_s27 = sshll.u32 %s230_s28, 4  ;;  %s909_s11 = scalar_lea.hbm %s961_s3, %s457_s9  ;;  %s904_s27 = int_to_ptr.vmem [resolvable:$true] %s312_s27 }
  0x69   : > { %v248_v17 = vadd.f32 %v247_v10, %v244_v11  ;;  %v270_v22 = vmul.f32 %v436_v4, %v269_v20  ;;  %v281_v24 = vstv %s447_s19  ;;  %v279_v27 = vmul.f32 %v278_v23, %v231_v0  ;;  %s603_s4 = scalar_lea.vmem %s904_s27, 192  ;;  %s700_s15 = smov [#allocation9]  }
  0x6a   : > { %v263_v26 = vadd.f32 %v262_v18, %v259_v14  ;;  %v282_v28 = vmul.f32 %v434_v1, %v281_v24  ;;  %v285_v29 = vstv %s448_s6  ;;  %v289_v30 = vstv %s892_s7  ;;  %p604_p4 = scmp.ne.s32.totalorder %s904_s27, %s603_s4  ;;  %s607_s18 = sshll.u32 %s700_s15, 4  ;;  %s608_s18 = int_to_ptr.vmem [resolvable:$false] %s607_s18 }
  0x6b   : > { %v252_v25 = vadd.f32 %v251_v12, %v248_v17  ;;  %v286_v34 = vmul.f32 %v435_v2, %v285_v29  ;;  %v273_v35 = vstv %s894_s25  ;;  %v290_v36 = vmul.f32 %v436_v4, %v289_v30  ;;  %s609_s22 = scalar_lea.vmem %s608_s18, 384  ;;  %p610_p10 = scmp.lt.s32.totalorder %s904_s27, %s608_s18 }
  0x6c   : > { %v267_v32 = vadd.f32 %v266_v19, %v263_v26  ;;  %v283_v33 = vadd.f32 %v282_v28, %v279_v27  ;;  %v293_v39 = vstv %s897_s30  ;;  %p605_p0 = pnand %p604_p4, %p975_p12  ;;  %p611_p11 = scmp.lt.s32.totalorder %s609_s22, %s603_s4 }
  0x6d   : > { %v255_v31 = vadd.f32 %v254_v21, %v252_v25 }
  0x6e   : > { %v271_v37 = vadd.f32 %v270_v22, %v267_v32  ;;  %v287_v38 = vadd.f32 %v286_v34, %v283_v33  ;;  %p606_p5 = pneg %p605_p0  ;;  %p612_p3 = por %p611_p11, %p610_p10 }
  0x6f   : > { %256 = vst [vmem:[%s230_s28] sm:$0xf] %v255_v31 }
  0x70   : > { %v274_v40 = vadd.f32 %v273_v35, %v271_v37  ;;  %v291_v41 = vadd.f32 %v290_v36, %v287_v38  ;;  %p613_p7 = pnand %p612_p3, %p606_p5 }
  0x72   : > { %445 = vst [vmem:[%s230_s28 + $0x4] sm:$0xf] %v274_v40  ;;  %v294_v42 = vadd.f32 %v293_v39, %v291_v41 }
  0x74   : > { %451 = vst [vmem:[%s230_s28 + $0x8] sm:$0xf] %v294_v42 }
  0x75   : > { %616 = shalt.err (!%p613_p7)
}
  0x76   : > { %s617_s19 = scalar_lea.hbm %s909_s11, 192  ;;  %s621_s25 = scalar_lea.hbm %s961_s3, 384 }
  0x77   : > { %p618_p9 = scmp.ne.s32.totalorder %s909_s11, %s617_s19  ;;  %p622_p1 = scmp.lt.u32.totalorder %s909_s11, %s961_s3 }
  0x78   : > { %p623_p8 = scmp.lt.u32.totalorder %s621_s25, %s617_s19  ;;  %p625_p4 = scmp.lt.u32.totalorder %s617_s19, %s909_s11 }
  0x79   : > { %p619_p2 = pnand %p618_p9, %p975_p12 }
  0x7a   : > { %p624_p13 = por %p623_p8, %p622_p1 }
  0x7b   : > { %p620_p6 = pneg %p619_p2 }
  0x7c   : > { %p626_p0 = por %p625_p4, %p624_p13 }
  0x7e   : > { %p627_p5 = pnand %p626_p0, %p620_p6 }
  0x80   : > { %630 = shalt.err (!%p627_p5)
}
  0x81   : > { %s701_s28 = smov 64   ;;  %s702_s9 = smov 4  }
  0x82   : > { %468 = dma.vmem_to_hbm [thread:$0]  (%p975_p12), %s904_s27, 192, %s909_s11, %s298_s20, %s701_s28, %s701_s28, %s702_s9  }
  0x83 PF: > { %s327_s21 = sand.u32 1, %s673_s12   ;;  %p976_p10 = scmp.ne.s32.totalorder %s969_s24, 0 }
  0x84   : > { %p977_p11 = scmp.ge.s32.totalorder %s693_s17, 2  ;;  %s328_s10 = scalar_lea.sflag [#allocation4], %s327_s21 }
  0x86   : > { %p482_p3 = pnand %p977_p11, %p976_p10 }
  0x88   : > { %668 = dma.done.wait (!%p482_p3), %s328_s10, 192  }
  0x89   : > { %670 = vsyncadd (!%p482_p3), %s328_s10, 4294967104  ;;  %s21_s17 = sadd.s32 1, %s693_s17   ;;  %s978_s12 = smov %s677_s13 }
  0x8a   : > { %p18_p7 = scmp.ge.s32.totalorder %s21_s17, 4   ;;  %s979_s13 = smov %s681_s14 }
  0x8b   : > { %s980_s14 = smov %s839_s26  ;;  %s981_s15 = smov %s689_s16 }
  0x8c   : > { %s982_s16 = smov %s984_s5  ;;  %20 = sbr.rel (!%p18_p7) target bundleno = 8 (0x8), region = 92 }
  0x93   :  { %333 = vsyncpa [#allocation3], 1 }
  0x94   :  { %335 = vsyncpa [#allocation3 + $0x1], 1 }
  0x95   :  { %336 = vsyncpa [#allocation4], 1 }
  0x96   :  { %338 = vsyncpa [#allocation4 + $0x1], 1 }
  0x97   :  { %339 = vsyncpa [#allocation5], 1 }
  0x98   :  { %341 = vsyncpa [#allocation5 + $0x1], 1 }
  0x99   :  { %342 = vsyncpa [#allocation6], 1 }
  0x9a   :  { %344 = vsyncpa [#allocation6 + $0x1], 1 }

</bundles_post_ra>
